<compile_context>
chip_gen: v5e
topology: v5e:2x2
jax: 0.10.0
libtpu: 0.0.40
codegen_flags: <defaults>
</compile_context>

<pallas_src>
import functools

import jax
import jax.numpy as jnp
from jax.experimental import pallas as pl
from jax.experimental.pallas import tpu as pltpu


# ----------------------------------------------------------------------------
# Pallas kernel: in-VMEM im2col (as a 2x2/s1 conv on the space-to-depth input)
# -> conv GEMM (+bias, ReLU) -> embedding-projection GEMM (+bias).
# ----------------------------------------------------------------------------
def _hybrid_embed_kernel(s_ref, s_edge_ref, wq_ref, bc_ref, wp_ref, bp_ref,
                         o_ref):
    th, wo1, c4 = s_ref.shape          # (tile_h, Wf+1, 4*C_in)
    wo = wo1 - 1
    m = th * wo                        # output patches produced this step

    s_cur = s_ref[...]                                          # parity rows r
    if th > 1:                                                  # parity rows r+1
        s_nxt = jnp.concatenate([s_cur[1:], s_edge_ref[...]], axis=0)
    else:
        s_nxt = s_edge_ref[...]

    def slab(src, dx):                 # (tile_h, Wf, 4*C_in) -> (m, 4*C_in)
        return src[:, dx:dx + wo, :].reshape(m, c4)

    # Conv-as-GEMM: 4 accumulated MXU matmuls, f32 accumulation.
    feats = jnp.dot(slab(s_cur, 0), wq_ref[0], preferred_element_type=jnp.float32)
    feats += jnp.dot(slab(s_cur, 1), wq_ref[1], preferred_element_type=jnp.float32)
    feats += jnp.dot(slab(s_nxt, 0), wq_ref[2], preferred_element_type=jnp.float32)
    feats += jnp.dot(slab(s_nxt, 1), wq_ref[3], preferred_element_type=jnp.float32)

    # Bias + ReLU epilogue in f32 (VPU; v5e has no bf16 VPU path).
    feats = jnp.maximum(feats + bc_ref[...], 0.0)

    # Embedding projection (MXU bf16 fast path on v6e/v7x; f32 accumulation).
    out = jnp.dot(feats.astype(wp_ref.dtype), wp_ref[...],
                  preferred_element_type=jnp.float32) + bp_ref[...]
    o_ref[...] = out.astype(o_ref.dtype)


# ----------------------------------------------------------------------------
# Glue (all ~1x raw-input bytes; the patch matrix never hits HBM).
# ----------------------------------------------------------------------------
def _space_to_depth_pad1(x_nhwc, compute_dtype):
    """(N,H,W,C) -> (N, H/2+1, W/2+1, 4C): 2x2 parity split of the pad=1 input."""
    n, h, w, c = x_nhwc.shape
    assert h % 2 == 0 and w % 2 == 0, "stride-2 backbone assumes even H, W"
    xp = jnp.pad(x_nhwc, ((0, 0), (1, 1), (1, 1), (0, 0)))
    hh, wh = (h + 2) // 2, (w + 2) // 2
    s = xp.reshape(n, hh, 2, wh, 2, c)
    s = jnp.transpose(s, (0, 1, 3, 2, 4, 5))     # (N, hh, wh, row-par, col-par, C)
    return s.reshape(n, hh, wh, 4 * c).astype(compute_dtype)


def _pack_conv_weight(w_conv, c_in):
    """Permute the (9*C_in, F) k3/s2 GEMM weight (rows ordered kk=kh*3+kw,
    channel-minor) into the (4, 4*C_in, F) k2/s1 weight over the
    space-to-depth input; taps that fall outside the 3x3 window are zero."""
    f = w_conv.shape[1]
    row = lambda kk: w_conv[kk * c_in:(kk + 1) * c_in]
    zero = jnp.zeros((c_in, f), w_conv.dtype)
    w00 = jnp.concatenate([row(0), row(1), row(3), row(4)], axis=0)  # S[r  , c  ]
    w01 = jnp.concatenate([row(2), zero,   row(5), zero  ], axis=0)  # S[r  , c+1]
    w10 = jnp.concatenate([row(6), row(7), zero,   zero  ], axis=0)  # S[r+1, c  ]
    w11 = jnp.concatenate([row(8), zero,   zero,   zero  ], axis=0)  # S[r+1, c+1]
    return jnp.stack([w00, w01, w10, w11], axis=0)


def _pick_tile_h(ho, wo, batch, requested):
    """Largest divisor of ho <= requested whose tile_h*wo output rows are
    8-aligned (or the full image); prefer >= 2 total grid steps for v7x."""
    divisors = [d for d in range(1, ho + 1) if ho % d == 0]
    legal = [d for d in divisors if d == ho or (d * wo) % 8 == 0]
    cand = [d for d in legal if d <= max(1, requested)] or legal
    th = max(cand)
    if batch * (ho // th) < 2:                      # keep both v7x TCs busy
        smaller = [d for d in cand if ho // d >= 2]
        if smaller:
            th = max(smaller)
    return th


def hybrid_embed_forward(x_nchw, w_conv, b_conv, w_proj, b_proj, *,
                         compute_dtype=jnp.bfloat16, out_dtype=None,
                         tile_h=32):
    """x: (N, C_in, H, W) -> (N, (H//2)*(W//2), embed_dim)."""
    if out_dtype is None:
        out_dtype = compute_dtype
    n, c_in, h, w = x_nchw.shape
    ho, wo = h // 2, w // 2
    f = w_conv.shape[1]
    e = w_proj.shape[1]
    assert w_conv.shape[0] == 9 * c_in

    s = _space_to_depth_pad1(jnp.transpose(x_nchw, (0, 2, 3, 1)), compute_dtype)
    wq = _pack_conv_weight(w_conv, c_in).astype(compute_dtype)   # (4, 4C, F)
    wp = w_proj.astype(compute_dtype)                            # (F, E)
    bc = b_conv.reshape(1, f).astype(jnp.float32)
    bp = b_proj.reshape(1, e).astype(jnp.float32)

    th = _pick_tile_h(ho, wo, n, tile_h)
    n_hb = ho // th
    grid = (n, n_hb)

    m_total = n * ho * wo
    in_bytes = s.size * s.dtype.itemsize
    cost = pl.CostEstimate(
        flops=int(2 * m_total * (16 * c_in * f + f * e)),
        transcendentals=0,
        bytes_accessed=int(in_bytes + in_bytes // max(th, 1)      # main + edge rows
                           + wq.size * wq.dtype.itemsize
                           + wp.size * wp.dtype.itemsize
                           + (f + e) * 4
                           + m_total * e * jnp.dtype(out_dtype).itemsize),
    )

    return pl.pallas_call(
        _hybrid_embed_kernel,
        out_shape=jax.ShapeDtypeStruct((n, ho * wo, e), out_dtype),
        grid=grid,
        in_specs=[
            # tile_h space-to-depth rows of image `b` (streamed, double-buffered)
            pl.BlockSpec((None, th, wo + 1, 4 * c_in),
                         lambda b, hb: (b, hb, 0, 0)),
            # the single boundary row shared with the next tile (same array)
            pl.BlockSpec((None, 1, wo + 1, 4 * c_in),
                         lambda b, hb: (b, (hb + 1) * th, 0, 0)),
            # grid-invariant weights / biases (VMEM-resident full blocks)
            pl.BlockSpec((4, 4 * c_in, f), lambda b, hb: (0, 0, 0)),
            pl.BlockSpec((1, f), lambda b, hb: (0, 0)),
            pl.BlockSpec((f, e), lambda b, hb: (0, 0)),
            pl.BlockSpec((1, e), lambda b, hb: (0, 0)),
        ],
        out_specs=pl.BlockSpec((None, th * wo, e), lambda b, hb: (b, hb, 0)),
        compiler_params=pltpu.CompilerParams(
            dimension_semantics=("parallel", "parallel"),   # megacore on v7x
            vmem_limit_bytes=48 << 20,   # far under v7x 64 MiB / v5e-v6e 128 MiB
        ),
        cost_estimate=cost,
    )(s, s, wq, bc, wp, bp)


# ----------------------------------------------------------------------------
# Pure-JAX f32 reference (mirrors the PyTorch forward semantics, im2col form).
# ----------------------------------------------------------------------------
def hybrid_embed_reference(x_nchw, w_conv, b_conv, w_proj, b_proj):
    x = jnp.transpose(x_nchw, (0, 2, 3, 1))
    n, h, w, c = x.shape
    ho, wo = h // 2, w // 2
    xp = jnp.pad(x, ((0, 0), (1, 1), (1, 1), (0, 0)))
    cols = [xp[:, kh:kh + 2 * ho:2, kw:kw + 2 * wo:2, :]
            for kh in range(3) for kw in range(3)]
    patches = jnp.concatenate(cols, axis=-1).reshape(n * ho * wo, 9 * c)
    feats = jnp.maximum(patches @ w_conv + b_conv, 0.0)     # backbone output
    out = feats @ w_proj + b_proj                            # self.proj
    return out.reshape(n, ho * wo, w_proj.shape[1])


if __name__ == "__main__":
    # batch=2, in_chans=4, img 16x16 -> feature map 8x8 (stride-2 backbone),
    # feature_dim=32, embed_dim=32, num_patches=64.
    n, c_in, h, w = 2, 4, 16, 16
    feature_dim, embed_dim = 32, 32
    k = 9 * c_in

    key = jax.random.PRNGKey(0)
    kx, kwc, kbc, kwp, kbp = jax.random.split(key, 5)
    x = jax.random.normal(kx, (n, c_in, h, w), dtype=jnp.float32)
    # Deterministic synthetic parameters (conv weight stored in GEMM layout).
    w_conv = jax.random.normal(kwc, (k, feature_dim), dtype=jnp.float32) * 0.1
    b_conv = jax.random.normal(kbc, (feature_dim,), dtype=jnp.float32) * 0.1
    w_proj = jax.random.normal(kwp, (feature_dim, embed_dim), dtype=jnp.float32) * 0.1
    b_proj = jax.random.normal(kbp, (embed_dim,), dtype=jnp.float32) * 0.1

    ref = hybrid_embed_reference(x, w_conv, b_conv, w_proj, b_proj)

    # Primary path: bf16 compute + bf16 output.  tile_h=4 -> grid=(2, 2) so the
    # multi-step pipeline and the boundary-row spec are exercised.
    fwd_bf16 = jax.jit(functools.partial(
        hybrid_embed_forward, compute_dtype=jnp.bfloat16, tile_h=4))
    out_bf16 = jax.block_until_ready(fwd_bf16(x, w_conv, b_conv, w_proj, b_proj))
    assert out_bf16.shape == (n, (h // 2) * (w // 2), embed_dim), out_bf16.shape
    assert out_bf16.dtype == jnp.bfloat16
    err_bf16 = float(jnp.max(jnp.abs(out_bf16.astype(jnp.float32) - ref)))
    assert jnp.allclose(out_bf16.astype(jnp.float32), ref,
                        atol=5e-2, rtol=5e-2), err_bf16

    # Tight-tolerance f32 check of the same fused kernel structure.
    fwd_f32 = jax.jit(functools.partial(
        hybrid_embed_forward, compute_dtype=jnp.float32,
        out_dtype=jnp.float32, tile_h=4))
    out_f32 = jax.block_until_ready(fwd_f32(x, w_conv, b_conv, w_proj, b_proj))
    err_f32 = float(jnp.max(jnp.abs(out_f32 - ref)))
    assert jnp.allclose(out_f32, ref, atol=1e-3, rtol=1e-3), err_f32

    print("KERNEL_OK")
</pallas_src>

<mosaic_0001>
module attributes {stable_mosaic.version = 11 : i64} {
  func.func @_hybrid_embed_kernel(%arg0: i32, %arg1: i32, %arg2: memref<1x4x9x16xbf16, #tpu.memory_space<vmem>>, %arg3: memref<1x1x9x16xbf16, #tpu.memory_space<vmem>>, %arg4: memref<4x16x32xbf16, #tpu.memory_space<vmem>>, %arg5: memref<1x32xf32, #tpu.memory_space<vmem>>, %arg6: memref<32x32xbf16, #tpu.memory_space<vmem>>, %arg7: memref<1x32xf32, #tpu.memory_space<vmem>>, %arg8: memref<1x32x32xbf16, #tpu.memory_space<vmem>>) attributes {dimension_semantics = [#tpu.dimension_semantics<parallel>, #tpu.dimension_semantics<parallel>], iteration_bounds = array<i64: 2, 2>, scalar_prefetch = 0 : i64, scratch_operands = 0 : i64, tpu.core_type = #tpu.core_type<tc>, window_params = [{transform_indices = @transform_0, window_bounds = array<i64: 1, 4, 9, 16>}, {transform_indices = @transform_1, window_bounds = array<i64: 1, 1, 9, 16>}, {pipeline_mode = #tpu.pipeline_mode<synchronous>, transform_indices = @transform_2, window_bounds = array<i64: 4, 16, 32>}, {pipeline_mode = #tpu.pipeline_mode<synchronous>, transform_indices = @transform_3, window_bounds = array<i64: 1, 32>}, {pipeline_mode = #tpu.pipeline_mode<synchronous>, transform_indices = @transform_4, window_bounds = array<i64: 32, 32>}, {pipeline_mode = #tpu.pipeline_mode<synchronous>, transform_indices = @transform_5, window_bounds = array<i64: 1, 32>}, {transform_indices = @transform_6, window_bounds = array<i64: 1, 32, 32>}]} {
    %c0 = arith.constant 0 : index
    %c0_0 = arith.constant 0 : index
    %c0_1 = arith.constant 0 : index
    %c0_2 = arith.constant 0 : index
    %0 = vector.load %arg2[%c0, %c0_0, %c0_1, %c0_2] : memref<1x4x9x16xbf16, #tpu.memory_space<vmem>>, vector<1x4x9x16xbf16>
    %1 = vector.shape_cast %0 : vector<1x4x9x16xbf16> to vector<4x9x16xbf16>
    %2 = vector.extract_strided_slice %1 {offsets = [1, 0, 0], sizes = [3, 9, 16], strides = [1, 1, 1]} : vector<4x9x16xbf16> to vector<3x9x16xbf16>
    %c0_3 = arith.constant 0 : index
    %c0_4 = arith.constant 0 : index
    %c0_5 = arith.constant 0 : index
    %c0_6 = arith.constant 0 : index
    %3 = vector.load %arg3[%c0_3, %c0_4, %c0_5, %c0_6] : memref<1x1x9x16xbf16, #tpu.memory_space<vmem>>, vector<1x1x9x16xbf16>
    %4 = vector.shape_cast %3 : vector<1x1x9x16xbf16> to vector<1x9x16xbf16>
    %5 = tpu.concatenate %2, %4 in 0 : vector<3x9x16xbf16>, vector<1x9x16xbf16> -> vector<4x9x16xbf16>
    %6 = vector.extract_strided_slice %1 {offsets = [0, 0, 0], sizes = [4, 8, 16], strides = [1, 1, 1]} : vector<4x9x16xbf16> to vector<4x8x16xbf16>
    %7 = vector.shape_cast %6 : vector<4x8x16xbf16> to vector<32x16xbf16>
    %c0_7 = arith.constant 0 : index
    %c0_8 = arith.constant 0 : index
    %c0_9 = arith.constant 0 : index
    %8 = vector.load %arg4[%c0_7, %c0_8, %c0_9] : memref<4x16x32xbf16, #tpu.memory_space<vmem>>, vector<1x16x32xbf16>
    %9 = vector.shape_cast %8 : vector<1x16x32xbf16> to vector<16x32xbf16>
    %cst = arith.constant dense<0.000000e+00> : vector<32x32xf32>
    %10 = tpu.matmul %7, %9, %cst {dimension_numbers = #tpu.dot_dimension_numbers<[1], [0], [0], [1], [0, 0, 1, 1], [], []>} : vector<32x16xbf16>, vector<16x32xbf16>, vector<32x32xf32> -> vector<32x32xf32>
    %11 = vector.extract_strided_slice %1 {offsets = [0, 1, 0], sizes = [4, 8, 16], strides = [1, 1, 1]} : vector<4x9x16xbf16> to vector<4x8x16xbf16>
    %12 = vector.shape_cast %11 : vector<4x8x16xbf16> to vector<32x16xbf16>
    %c1 = arith.constant 1 : index
    %c0_10 = arith.constant 0 : index
    %c0_11 = arith.constant 0 : index
    %13 = vector.load %arg4[%c1, %c0_10, %c0_11] : memref<4x16x32xbf16, #tpu.memory_space<vmem>>, vector<1x16x32xbf16>
    %14 = vector.shape_cast %13 : vector<1x16x32xbf16> to vector<16x32xbf16>
    %cst_12 = arith.constant dense<0.000000e+00> : vector<32x32xf32>
    %15 = tpu.matmul %12, %14, %cst_12 {dimension_numbers = #tpu.dot_dimension_numbers<[1], [0], [0], [1], [0, 0, 1, 1], [], []>} : vector<32x16xbf16>, vector<16x32xbf16>, vector<32x32xf32> -> vector<32x32xf32>
    %16 = arith.addf %10, %15 : vector<32x32xf32>
    %17 = vector.extract_strided_slice %5 {offsets = [0, 0, 0], sizes = [4, 8, 16], strides = [1, 1, 1]} : vector<4x9x16xbf16> to vector<4x8x16xbf16>
    %18 = vector.shape_cast %17 : vector<4x8x16xbf16> to vector<32x16xbf16>
    %c2 = arith.constant 2 : index
    %c0_13 = arith.constant 0 : index
    %c0_14 = arith.constant 0 : index
    %19 = vector.load %arg4[%c2, %c0_13, %c0_14] : memref<4x16x32xbf16, #tpu.memory_space<vmem>>, vector<1x16x32xbf16>
    %20 = vector.shape_cast %19 : vector<1x16x32xbf16> to vector<16x32xbf16>
    %cst_15 = arith.constant dense<0.000000e+00> : vector<32x32xf32>
    %21 = tpu.matmul %18, %20, %cst_15 {dimension_numbers = #tpu.dot_dimension_numbers<[1], [0], [0], [1], [0, 0, 1, 1], [], []>} : vector<32x16xbf16>, vector<16x32xbf16>, vector<32x32xf32> -> vector<32x32xf32>
    %22 = arith.addf %16, %21 : vector<32x32xf32>
    %23 = vector.extract_strided_slice %5 {offsets = [0, 1, 0], sizes = [4, 8, 16], strides = [1, 1, 1]} : vector<4x9x16xbf16> to vector<4x8x16xbf16>
    %24 = vector.shape_cast %23 : vector<4x8x16xbf16> to vector<32x16xbf16>
    %c3 = arith.constant 3 : index
    %c0_16 = arith.constant 0 : index
    %c0_17 = arith.constant 0 : index
    %25 = vector.load %arg4[%c3, %c0_16, %c0_17] : memref<4x16x32xbf16, #tpu.memory_space<vmem>>, vector<1x16x32xbf16>
    %26 = vector.shape_cast %25 : vector<1x16x32xbf16> to vector<16x32xbf16>
    %cst_18 = arith.constant dense<0.000000e+00> : vector<32x32xf32>
    %27 = tpu.matmul %24, %26, %cst_18 {dimension_numbers = #tpu.dot_dimension_numbers<[1], [0], [0], [1], [0, 0, 1, 1], [], []>} : vector<32x16xbf16>, vector<16x32xbf16>, vector<32x32xf32> -> vector<32x32xf32>
    %28 = arith.addf %22, %27 : vector<32x32xf32>
    %c0_19 = arith.constant 0 : index
    %c0_20 = arith.constant 0 : index
    %29 = vector.load %arg5[%c0_19, %c0_20] : memref<1x32xf32, #tpu.memory_space<vmem>>, vector<1x32xf32>
    %30 = vector.broadcast %29 : vector<1x32xf32> to vector<32x32xf32>
    %31 = arith.addf %28, %30 : vector<32x32xf32>
    %cst_21 = arith.constant 0.000000e+00 : f32
    %32 = vector.broadcast %cst_21 : f32 to vector<32x32xf32>
    %33 = arith.maximumf %31, %32 : vector<32x32xf32>
    %34 = arith.truncf %33 : vector<32x32xf32> to vector<32x32xbf16>
    %c0_22 = arith.constant 0 : index
    %c0_23 = arith.constant 0 : index
    %35 = vector.load %arg6[%c0_22, %c0_23] : memref<32x32xbf16, #tpu.memory_space<vmem>>, vector<32x32xbf16>
    %cst_24 = arith.constant dense<0.000000e+00> : vector<32x32xf32>
    %36 = tpu.matmul %34, %35, %cst_24 {dimension_numbers = #tpu.dot_dimension_numbers<[1], [0], [0], [1], [0, 0, 1, 1], [], []>} : vector<32x32xbf16>, vector<32x32xbf16>, vector<32x32xf32> -> vector<32x32xf32>
    %c0_25 = arith.constant 0 : index
    %c0_26 = arith.constant 0 : index
    %37 = vector.load %arg7[%c0_25, %c0_26] : memref<1x32xf32, #tpu.memory_space<vmem>>, vector<1x32xf32>
    %38 = vector.broadcast %37 : vector<1x32xf32> to vector<32x32xf32>
    %39 = arith.addf %36, %38 : vector<32x32xf32>
    %40 = arith.truncf %39 : vector<32x32xf32> to vector<32x32xbf16>
    %c0_27 = arith.constant 0 : index
    %c0_28 = arith.constant 0 : index
    %c0_29 = arith.constant 0 : index
    %41 = vector.load %arg8[%c0_27, %c0_28, %c0_29] : memref<1x32x32xbf16, #tpu.memory_space<vmem>>, vector<1x32x32xbf16>
    %42 = vector.shape_cast %41 : vector<1x32x32xbf16> to vector<32x32xbf16>
    %43 = vector.shape_cast %40 : vector<32x32xbf16> to vector<1x32x32xbf16>
    tpu.vector_store %arg8[%c0_27, %c0_28, %c0_29], %43 {strides = array<i32>} : memref<1x32x32xbf16, #tpu.memory_space<vmem>>, vector<1x32x32xbf16>,
    return
  }
  func.func @transform_0(%arg0: i32, %arg1: i32) -> (i32, i32, i32, i32) {
    %c0_i32 = arith.constant 0 : i32
    %c0_i32_0 = arith.constant 0 : i32
    %c0_i32_1 = arith.constant 0 : i32
    return %arg0, %arg1, %c0_i32, %c0_i32_0 : i32, i32, i32, i32
  }
  func.func @transform_1(%arg0: i32, %arg1: i32) -> (i32, i32, i32, i32) {
    %c1_i32 = arith.constant 1 : i32
    %0 = arith.addi %arg1, %c1_i32 : i32
    %c4_i32 = arith.constant 4 : i32
    %1 = arith.muli %0, %c4_i32 : i32
    %c0_i32 = arith.constant 0 : i32
    %c0_i32_0 = arith.constant 0 : i32
    %c0_i32_1 = arith.constant 0 : i32
    return %arg0, %1, %c0_i32, %c0_i32_0 : i32, i32, i32, i32
  }
  func.func @transform_2(%arg0: i32, %arg1: i32) -> (i32, i32, i32) {
    %c0_i32 = arith.constant 0 : i32
    %c0_i32_0 = arith.constant 0 : i32
    %c0_i32_1 = arith.constant 0 : i32
    %c0_i32_2 = arith.constant 0 : i32
    return %c0_i32, %c0_i32_0, %c0_i32_1 : i32, i32, i32
  }
  func.func @transform_3(%arg0: i32, %arg1: i32) -> (i32, i32) {
    %c0_i32 = arith.constant 0 : i32
    %c0_i32_0 = arith.constant 0 : i32
    %c0_i32_1 = arith.constant 0 : i32
    return %c0_i32, %c0_i32_0 : i32, i32
  }
  func.func @transform_4(%arg0: i32, %arg1: i32) -> (i32, i32) {
    %c0_i32 = arith.constant 0 : i32
    %c0_i32_0 = arith.constant 0 : i32
    %c0_i32_1 = arith.constant 0 : i32
    return %c0_i32, %c0_i32_0 : i32, i32
  }
  func.func @transform_5(%arg0: i32, %arg1: i32) -> (i32, i32) {
    %c0_i32 = arith.constant 0 : i32
    %c0_i32_0 = arith.constant 0 : i32
    %c0_i32_1 = arith.constant 0 : i32
    return %c0_i32, %c0_i32_0 : i32, i32
  }
  func.func @transform_6(%arg0: i32, %arg1: i32) -> (i32, i32, i32) {
    %c0_i32 = arith.constant 0 : i32
    %c0_i32_0 = arith.constant 0 : i32
    return %arg0, %arg1, %c0_i32 : i32, i32, i32
  }
}

</mosaic_0001>

<bundles_post_ra>
// kernel: hybrid_embed_forward.1
= control target key start
LH: loop header
LB: loop body
LE: loop exit
PB: predicated region body
PF: predicated region fallthrough
CT: control target
= control target key end

     0   :  { %s990_s21 = smov 0   ;;  %s992_s22 = smov 0   ;;  %s1143_s0 = inlined_call_operand.vmem [shape: bf16[2,9,9,16], index: 0, kind: input, shape index: {}, may-alias: {0,1}]   ;;  %s1144_s1 = inlined_call_operand.vmem [shape: bf16[2,9,9,16], index: 1, kind: input, shape index: {}, may-alias: {0,1}]   ;;  %s1145_s2 = inlined_call_operand.vmem [shape: bf16[4,16,32], index: 2, kind: input, shape index: {}]   ;;  %s1146_s3 = inlined_call_operand.vmem [shape: f32[1,32], index: 3, kind: input, shape index: {}]   ;;  %s1147_s4 = inlined_call_operand.vmem [shape: bf16[32,32], index: 4, kind: input, shape index: {}]   ;;  %s1148_s5 = inlined_call_operand.vmem [shape: f32[1,32], index: 5, kind: input, shape index: {}]   ;;  %s1149_s6 = inlined_call_operand.vmem [shape: bf16[2,64,32], index: 6, kind: output, shape index: {}]  }
   0x1   :  { %s994_s23 = smov 0   ;;  %s996_s24 = smov 0  }
   0x2   :  { %s998_s25 = smov 0  }
   0x3 LB: > { %s25_s26 = sadd.s32 1, %s945_s23  ;;  %s28_s27 = sadd.s32 1, %s949_s24  ;;  %s953_s25 = sphi %s998_s25, %s16_s25   ;;  %s949_s24 = sphi %s996_s24, %s1156_s24   ;;  %s945_s23 = sphi %s994_s23, %s1155_s23   ;;  %s941_s22 = sphi %s992_s22, %s1154_s22   ;;  %s937_s21 = sphi %s990_s21, %s1153_s21  }
   0x4   : > { %p26_p0 = scmp.ge.s32.totalorder %s25_s26, 2  ;;  %p807_p1 = scmp.ge.s32.totalorder %s953_s25, 1 }
   0x5   : > { %p268_p2 = scmp.lt.s32.totalorder %s953_s25, 5 }
   0x6   : > { %s1158_s26 = smov (%p26_p0, %s25_s26), 0  ;;  %s1160_s27 = smov (!%p26_p0, %s28_s27), %s949_s24 }
   0x7   : > { %p269_p3 = pnand %p807_p1, %p268_p2  ;;  %p30_p4 = scmp.ge.s32.totalorder %s1160_s27, 2 }
   0x8   : > { %s1023_s30 = sshll.u32 (!%p269_p3), %s937_s21, 2  ;;  %p329_p5 = scmp.lt.s32.totalorder (!%p269_p3), %s941_s22, 1 }
   0x9   : > { %s1162_s27 = smov (%p30_p4, %s1160_s27), 0  ;;  %272 = sbr.rel (%p269_p3) target bundleno = 353 (0x161), region = 44 }
   0xa   : > { %p331_p6 = scmp.lt.s32.totalorder (!%p269_p3), %s1023_s30, 8  ;;  %s864_s16 = sadd.s32 (!%p269_p3), 4, %s1023_s30 }
   0xb   : > { %p1047_p7 = scmp.lt.s32.totalorder (!%p269_p3), %s864_s16, 8  ;;  %p360_p8 = scmp.lt.s32.totalorder (!%p269_p3), %s1023_s30, 7 }
   0xe   : > { %v866_v0 = vld [vmem:[%s1145_s2 + $0x8] sm:$0xff]  ;;  %v865_v1 = vld [vmem:[%s1145_s2] sm:$0xff]  ;;  %v867_v2 = vld [vmem:[%s1145_s2 + $0x10] sm:$0xff]  ;;  %s1164_s22 = smov (!%p329_p5, %s941_s22), 1  ;;  %vm380_vm0 = vsmask.f32 3328 }
   0xf   : > { %v868_v3 = vld [vmem:[%s1145_s2 + $0x18] sm:$0xff]  ;;  %871 = vmatpush.bf16.msra.mxu1 %v866_v0  ;;  %468 = vmatpush.bf16.msra.mxu0 %v866_v0  ;;  %s332_s13 = scalar_select %p331_p6, %s1023_s30, 8  ;;  %vm381_vm1 = vsmask.f32 7440  ;;  %vm454_vm2 = vcmask 130048   ;;  %vm652_vm4 = vcmask 261120  }
  0x10   : > { %547 = vmatpush.bf16.msra.mxu2 %v867_v2  ;;  %s872_s14 = smul.u32 18, %s1164_s22  ;;  %602 = vmatpush.bf16.msra.mxu3 %v868_v3  ;;  %s1166_s16 = smov (!%p1047_p7, %s864_s16), 8  ;;  %vm1074_vm3 = vmor %vm380_vm0, %vm381_vm1  ;;  %vm682_vm5 = vcmask 257024  }
  0x11   : > { %s809_s15 = sshll.u32 %s332_s13, 1  ;;  %s812_s29 = sshll.u32 %s1166_s16, 1 }
  0x12   : > { %s335_s17 = sadd.s32 %s872_s14, %s809_s15  ;;  %s352_s7 = sadd.s32 %s872_s14, %s812_s29 }
  0x13   : > { %509 = vmatpush.bf16.msrb.mxu1 %v865_v1  ;;  %s810_s18 = sshll.u32 %s335_s17, 2  ;;  %s813_s8 = sshll.u32 %s352_s7, 2 }
  0x14   : > { %s337_s21 = scalar_lea.vmem %s1143_s0, %s810_s18  ;;  %s354_s11 = scalar_lea.vmem %s1144_s1, %s813_s8 }
  0x15   : > { %v1051_v4 = vld [vmem:[%s337_s21 + $0x10] sm:$0xf]  ;;  %v373_v5 = vld [vmem:[%s337_s21 + $0x14] sm:$0x1]  ;;  %v1053_v6 = vld [vmem:[%s337_s21 + $0x18] sm:$0xf] }
  0x16   : > { %v375_v7 = vld [vmem:[%s337_s21 + $0x1c] sm:$0x1]  ;;  %v412_v8 = vshrl.u32 %v1051_v4, 16  ;;  %v415_v9 = vshll.u32 %v1051_v4, 16  ;;  %v421_v10 = vshll.u32 %v373_v5, 16  ;;  %v426_v11 = vshrl.u32 %v1053_v6, 16 }
  0x17   : > { %v429_v12 = vshll.u32 %v1053_v6, 16  ;;  %v435_v13 = vshll.u32 %v375_v7, 16  ;;  %v1059_v14 = vld [vmem:[%s337_s21 + $0x8] sm:$0xf]  ;;  %v486_v15 = vunpack.c.l.b16 %v1051_v4  ;;  %v371_v16 = vld [vmem:[%s337_s21 + $0xc] sm:$0x1]  ;;  %v487_v2 = vunpack.c.l.b16 %v1053_v6 }
  0x18   : > { %v414_v17 = vrot.slane %v412_v8, 4  ;;  %v417_v18 = vrot.slane %v415_v9, 5  ;;  %v423_v19 = vrot.slane %v421_v10, 5  ;;  %v428_v20 = vrot.slane %v426_v11, 4  ;;  %v1062_v21 = vld [vmem:[%s337_s21] sm:$0xf] }
  0x19   : > { %v431_v22 = vrot.slane %v429_v12, 5  ;;  %v437_v23 = vrot.slane %v435_v13, 5  ;;  %v398_v24 = vshrl.u32 %v1059_v14, 16  ;;  %v401_v25 = vshll.u32 %v1059_v14, 16  ;;  %v369_v29 = vld [vmem:[%s337_s21 + $0x4] sm:$0x1] }
  0x1a   : > { %v418_v26 = vor.u32 %v417_v18, %v414_v17  ;;  %v485_v27 = vunpack.c.l.b16 %v1059_v14  ;;  %v407_v28 = vshll.u32 %v371_v16, 16  ;;  %v384_v30 = vshrl.u32 %v1062_v21, 16  ;;  %v376_v51 = vld [vmem:[%s354_s11] sm:$0xf]  ;;  %v377_v52 = vld [vmem:[%s354_s11 + $0x4] sm:$0x1] }
  0x1b   : > { %v432_v32 = vor.u32 %v431_v22, %v428_v20  ;;  %v400_v33 = vrot.slane %v398_v24, 4  ;;  %v403_v34 = vrot.slane %v401_v25, 5  ;;  %v387_v35 = vshll.u32 %v1062_v21, 16  ;;  %v870_v16 = vld [vmem:[%s1147_s4 + $0x8] sm:$0xff]  ;;  %v869_v18 = vld [vmem:[%s1147_s4] sm:$0xff]  ;;  %s1168_s30 = smov (!%p360_p8, %s1023_s30), 7 }
  0x1c   : > { %v419_v36 = vrot.slane %v418_v26, 4  ;;  %v526_v37 = vpack.c.b16 %v486_v15, %v485_v27  ;;  %v409_v38 = vrot.slane %v407_v28, 5  ;;  %v386_v39 = vrot.slane %v384_v30, 4  ;;  %665 = vmatpush.bf16.msrb.mxu0 %v870_v16  ;;  %s815_s18 = sshll.u32 %s1164_s22, 3 }
  0x1d   : > { %v433_v40 = vrot.slane %v432_v32, 4  ;;  %v404_v41 = vor.u32 %v403_v34, %v400_v33  ;;  %v389_v42 = vrot.slane %v387_v35, 5  ;;  %v393_v43 = vshll.u32 %v369_v29, 16  ;;  %v913_v29 = vld [vmem:[%s1146_s3] ss:$0 sm:$0xff]  ;;  %s363_s19 = sadd.s32 %s815_s18, %s1168_s30 }
  0x1e   : > { %v424_v44 = vsel %vm1074_vm3, %v419_v36, %v423_v19  ;;  %837 = vmatmul.msk.bf16.vlgmr.msra.gmra.mxu2 %vm454_vm2, %v526_v37  ;;  %v564_v55 = vshrl.u32 %v376_v51, 16  ;;  %v567_v58 = vshll.u32 %v376_v51, 16  ;;  %v573_v61 = vshll.u32 %v377_v52, 16  ;;  %s816_s28 = sshll.u32 %s363_s19, 2 }
  0x1f   : > { %v438_v45 = vsel %vm1074_vm3, %v433_v40, %v437_v23  ;;  %v444_v46 = vunpack.c.l.b16 %v424_v44  ;;  %v405_v47 = vrot.slane %v404_v41, 4  ;;  %v390_v48 = vor.u32 %v389_v42, %v386_v39  ;;  %s365_s8 = scalar_lea.vmem %s1149_s6, %s816_s28 }
  0x20   : > { %v445_v49 = vunpack.c.l.b16 %v438_v45  ;;  %v395_v50 = vrot.slane %v393_v43, 5  ;;  %v566_v60 = vrot.slane %v564_v55, 4  ;;  %v569_v0 = vrot.slane %v567_v58, 5  ;;  %666 = vmatpush.bf16.msrb.mxu0 %v869_v18  ;;  %v914_v55 = vld [vmem:[%s1148_s5] ss:$0 sm:$0xff] }
  0x21   : > { %v410_v53 = vsel %vm1074_vm3, %v405_v47, %v409_v38  ;;  %v391_v54 = vrot.slane %v390_v48, 4  ;;  %v525_v3 = vunpack.c.l.b16 %v376_v51  ;;  %v575_v7 = vrot.slane %v573_v61, 5 }
  0x22   : > { %v447_v56 = vpack.c.b16 %v445_v49, %v444_v46  ;;  %v443_v57 = vunpack.c.l.b16 %v410_v53  ;;  %v570_v5 = vor.u32 %v569_v0, %v566_v60  ;;  %v484_v11 = vunpack.c.l.b16 %v1062_v21 }
  0x23   : > { %v396_v59 = vsel %vm1074_vm3, %v391_v54, %v395_v50  ;;  %v527_v9 = vpack.c.b16 %v525_v3, %v487_v2  ;;  %v489_v6 = vpack.c.b16 %v487_v2, %v486_v15 }
  0x24   : > { %824 = vmatmul.msk.bf16.vlgmr.msra.gmra.mxu1 %vm454_vm2, %v447_v56  ;;  %v581_v62 = vpack.c.b16 %v444_v46, %v443_v57  ;;  %v442_v63 = vunpack.c.l.b16 %v396_v59  ;;  %v571_v8 = vrot.slane %v570_v5, 4  ;;  %v488_v13 = vpack.c.b16 %v485_v27, %v484_v11 }
  0x26   : > { %845 = vmatmul.msk.bf16.vlgmr.msra.gmra.mxu3 %vm454_vm2, %v581_v62  ;;  %v446_v1 = vpack.c.b16 %v443_v57, %v442_v63  ;;  %v576_v10 = vsel %vm1074_vm3, %v571_v8, %v575_v7 }
  0x27   : > { %v580_v12 = vunpack.c.l.b16 %v576_v10 }
  0x28   : > { %823 = vmatmul.msk.bf16.vlgmr.msra.gmra.mxu0 %vm454_vm2, %v446_v1 }
  0x29   : > { %v582_v14 = vpack.c.b16 %v580_v12, %v445_v49 }
  0x2e   : > { %838 = vmatmul.msk.bf16.gmra.mxu2 %vm454_vm2, %v527_v9 }
  0x34   : > { %829 = vmatmul.msk.bf16.vlgmr.msrb.gmra.mxu1 %vm454_vm2, %v488_v13 }
  0x36   : > { %846 = vmatmul.msk.bf16.gmra.mxu3 %vm454_vm2, %v582_v14 }
  0x44   : > { %830 = vmatmul.msk.bf16.gmra.mxu1 %vm454_vm2, %v489_v6 }
  0xa1   : > { %v475_v17 = vpop.f32.mrf.mxu1  ;;  %v549_v20 = vpop.f32.mrf.mxu2 }
  0xa5   : > { %v470_v21 = vpop.f32.mrf.mxu0 }
  0xa9   : > { %v477_v19 = vpop.f32.mrf.mxu1  ;;  %v604_v22 = vpop.f32.mrf.mxu3 }
  0xaa   : > { %v551_v24 = vpop.f32.mrf.mxu2 }
  0xad   : > { %v472_v25 = vpop.f32.mrf.mxu0 }
  0xb1   : > { %v511_v23 = vpop.f32.mrf.mxu1  ;;  %v606_v26 = vpop.f32.mrf.mxu3 }
  0xb2   : > { %v512_v4 = vadd.f32 %v511_v23, %v470_v21  ;;  %v554_v35 = vpop.f32.mrf.mxu2 }
  0xb4   : > { %v559_v15 = vadd.f32 %v549_v20, %v512_v4 }
  0xb6   : > { %v614_v28 = vadd.f32 %v604_v22, %v559_v15 }
  0xb8   : > { %v622_v32 = vadd.f32 %v913_v29, %v614_v28 }
  0xb9   : > { %v513_v27 = vpop.f32.mrf.mxu1  ;;  %v609_v40 = vpop.f32.mrf.mxu3 }
  0xba   : > { %v514_v30 = vadd.f32 %v513_v27, %v472_v25  ;;  %v626_v37 = vmax.f32 %v622_v32, 0.0  ;;  %v556_v46 = vpop.f32.mrf.mxu2 }
  0xbc   : > { %v560_v31 = vadd.f32 %v551_v24, %v514_v30 }
  0xbe   : > { %v615_v33 = vadd.f32 %v606_v26, %v560_v31 }
  0xc0   : > { %v623_v34 = vadd.f32 %v913_v29, %v615_v33 }
  0xc1   : > { %v516_v36 = vpop.f32.mrf.mxu1  ;;  %v611_v48 = vpop.f32.mrf.mxu3 }
  0xc2   : > { %v627_v38 = vmax.f32 %v623_v34, 0.0  ;;  %v517_v39 = vadd.f32 %v516_v36, %v475_v17 }
  0xc4   : > { %v630_v41 = vpack.c.bf16 %v627_v38, %v626_v37  ;;  %v561_v42 = vadd.f32 %v554_v35, %v517_v39 }
  0xc6   : > { %855 = vmatmul.msk.bf16.vlgmr.msrb.gmra.mxu0 %vm652_vm4, %v630_v41  ;;  %v616_v44 = vadd.f32 %v609_v40, %v561_v42 }
  0xc8   : > { %v624_v50 = vadd.f32 %v913_v29, %v616_v44 }
  0xc9   : > { %v518_v43 = vpop.f32.mrf.mxu1 }
  0xca   : > { %v519_v45 = vadd.f32 %v518_v43, %v477_v19  ;;  %v628_v52 = vmax.f32 %v624_v50, 0.0 }
  0xcc   : > { %v562_v47 = vadd.f32 %v556_v46, %v519_v45 }
  0xce   : > { %v617_v49 = vadd.f32 %v611_v48, %v562_v47 }
  0xd0   : > { %v625_v51 = vadd.f32 %v913_v29, %v617_v49 }
  0xd2   : > { %v629_v53 = vmax.f32 %v625_v51, 0.0 }
  0xd4   : > { %v631_v54 = vpack.c.bf16 %v629_v53, %v628_v52 }
  0xd6   : > { %856 = vmatmul.msk.bf16.gmra.mxu0 %vm652_vm4, %v631_v54 }
 0x143   : > { %v668_v56 = vpop.f32.mrf.mxu0 }
 0x144   : > { %v669_v57 = vadd.f32 %v914_v55, %v668_v56 }
 0x146   : > { %v678_v58 = vpack.c.bf16 %v669_v57, %v669_v57 }
 0x148   : > { %683 = vst.msk [vmem:[%s365_s8] sm:$0xf] %vm682_vm5, %v678_v58 }
 0x14b   : > { %v670_v59 = vpop.f32.mrf.mxu0 }
 0x14c   : > { %v671_v60 = vadd.f32 %v914_v55, %v670_v59 }
 0x14e   : > { %v679_v61 = vpack.c.bf16 %v671_v60, %v671_v60 }
 0x150   : > { %684 = vst.msk [vmem:[%s365_s8 + $0x4] sm:$0xf] %vm682_vm5, %v679_v61 }
 0x153   : > { %v673_v62 = vpop.f32.mrf.mxu0 }
 0x154   : > { %v674_v63 = vadd.f32 %v914_v55, %v673_v62 }
 0x156   : > { %v680_v0 = vpack.c.bf16 %v674_v63, %v674_v63 }
 0x158   : > { %685 = vst.msk [vmem:[%s365_s8 + $0x8] sm:$0xf] %vm682_vm5, %v680_v0 }
 0x15b   : > { %v675_v1 = vpop.f32.mrf.mxu0 }
 0x15c   : > { %v676_v2 = vadd.f32 %v914_v55, %v675_v1 }
 0x15e   : > { %v681_v3 = vpack.c.bf16 %v676_v2, %v676_v2 }
 0x160   : > { %686 = vst.msk [vmem:[%s365_s8 + $0xc] sm:$0xf] %vm682_vm5, %v681_v3 }
 0x161 PF: > { %s16_s25 = sadd.s32 1, %s953_s25   ;;  %s1153_s21 = smov %s945_s23 }
 0x162   : > { %p13_p9 = scmp.ge.s32.totalorder %s16_s25, 6   ;;  %s1154_s22 = smov %s949_s24 }
 0x163   : > { %s1155_s23 = smov %s1158_s26  ;;  %s1156_s24 = smov %s1162_s27 }
 0x164   :  { %15 = sbr.rel (!%p13_p9) target bundleno = 3 (0x3), region = 80 }

</bundles_post_ra>
